<compile_context>
chip_gen: v6e
topology: v6e:2x2x1
jax: 0.10.0
libtpu: 0.0.40
codegen_flags: <defaults>
</compile_context>

<pallas_src>
import jax
import jax.numpy as jnp
from jax import lax
from jax.experimental import pallas as pl
from jax.experimental.pallas import tpu as pltpu


def _head_kernel(x_ref, w_ref, o_ref):
    # x_ref: (bblk, T, C)   w_ref: (C, 3H) = [Wk | Wq | Wv]   o_ref: (bblk, T, H)
    bblk, T, C = x_ref.shape
    H = w_ref.shape[1] // 3
    in_dt = x_ref.dtype

    # Fold (batch_block, T) into the matmul M dimension and do ONE fused
    # projection (N = 3H = 192) — single MXU pass on v6e/v7x instead of three
    # underfilled N=64 passes.  Operands stay in their native dtype; the MXU
    # accumulates in f32.
    x2d = x_ref[...].reshape(bblk * T, C)
    kqv = jnp.dot(x2d, w_ref[...], preferred_element_type=jnp.float32)  # (bblk*T, 3H)

    # Static lane slices of the fused result.  The middle slice (q) costs one
    # lane rotate (XLU slot, otherwise idle here).  The score scale is folded
    # into q: B*T*H multiplies instead of B*T*T.
    # NOTE: scale uses C = n_embed (not head_size), faithful to the source.
    scale = jnp.float32(C) ** jnp.float32(-0.5)
    k = kqv[:, 0:H]
    q = kqv[:, H:2 * H] * scale
    v = kqv[:, 2 * H:3 * H]

    # Back to the input dtype for the downstream MXU matmuls (no-op for f32).
    # Reshape is layout-free when T is a multiple of the sublane tile (8 f32).
    k = k.astype(in_dt).reshape(bblk, T, H)
    q = q.astype(in_dt).reshape(bblk, T, H)
    v = v.astype(in_dt).reshape(bblk, T, H)

    # Batched attention scores: contract the last (head) axis of q and k
    # directly — native transposed-RHS MXU path, no materialized transpose.
    wei = lax.dot_general(
        q, k,
        dimension_numbers=(((2,), (2,)), ((0,), (0,))),
        preferred_element_type=jnp.float32,
    )  # (bblk, T, T)

    # Causal mask from a single row/col iota pair (broadcast compare).
    row = lax.broadcasted_iota(jnp.int32, (T, 1), 0)
    col = lax.broadcasted_iota(jnp.int32, (1, T), 1)
    causal = (col <= row)[None, :, :]                        # (1, T, T)
    wei = jnp.where(causal, wei, -jnp.inf)                   # diag always unmasked -> NaN-safe

    # Numerically stable softmax along the last dim; stats in f32,
    # reciprocal on the EUP (otherwise-idle slot).
    wei = wei - jnp.max(wei, axis=-1, keepdims=True)
    p = jnp.exp(wei)
    p = p * pl.reciprocal(jnp.sum(p, axis=-1, keepdims=True), approx=True)

    # Dropout: eval mode -> identity (no-op).

    # out = p @ v  (batched), f32 accumulate, stored in the output dtype.
    out = lax.dot_general(
        p.astype(in_dt), v,
        dimension_numbers=(((2,), (1,)), ((0,), (0,))),
        preferred_element_type=jnp.float32,
    )  # (bblk, T, H)
    o_ref[...] = out.astype(o_ref.dtype)


def _pick_batch_block(B, T, *, target_rows=512, max_score_bytes=4 << 20):
    """Pick how many batch elements to fuse per grid step.

    Constraints (in priority order):
      * bblk divides B,
      * keep >= 2 grid steps when B >= 2 (so v7x's two TensorCores both get
        work via the "parallel" grid axis; costs nothing on v5e/v6e),
      * f32 score/prob temporaries (2 * bblk * T * T * 4 bytes) stay under
        max_score_bytes (spill guard; hits v7x's 64 MiB VMEM first),
      * among remaining candidates, take the smallest with bblk*T >= target_rows
        (tall MXU matmuls, amortize the ~0.35us per-grid-step overhead), else
        the largest allowed.
    """
    candidates = [d for d in range(1, B + 1) if B % d == 0]
    if B >= 2:
        two_step = [d for d in candidates if B // d >= 2]
        if two_step:
            candidates = two_step
    max_by_scores = max(1, max_score_bytes // (2 * T * T * 4))
    bounded = [d for d in candidates if d <= max_by_scores]
    if bounded:
        candidates = bounded
    for d in candidates:
        if d * T >= target_rows:
            return d
    return candidates[-1]


def _vmem_limit_bytes(bblk, T, C, H, itemsize):
    """Scoped-VMEM budget for one grid step (double-buffered blocks + f32 temps)."""
    x_blk = bblk * T * C * itemsize
    o_blk = bblk * T * H * itemsize
    w_blk = C * 3 * H * itemsize
    # fused kqv f32 + k/q/v casted copies + wei + p (all f32)
    f32_tmp = bblk * T * (6 * H + 2 * T) * 4
    est = 2 * (x_blk + o_blk + w_blk) + f32_tmp
    # generous headroom, never below the 32 MiB default, never above v7x's 64 MiB.
    return int(min(max(2 * est, 32 << 20), 64 << 20))


def head_forward(x, wk, wq, wv):
    """x: [B, T, C]; wk/wq/wv: [C, H] -> out: [B, T, H]"""
    B, T, C = x.shape
    H = wk.shape[1]
    bblk = _pick_batch_block(B, T)

    # Fuse the three projection weights into one (C, 3H) operand -> single
    # MXU pass per grid step.  Tiny wrapper-side concat (C*3H elements).
    w_kqv = jnp.concatenate([wk, wq, wv], axis=1)

    itemsize = jnp.dtype(x.dtype).itemsize
    cost = pl.CostEstimate(
        flops=2 * B * T * C * 3 * H + 4 * B * T * T * H,
        transcendentals=B * T * T,
        bytes_accessed=(B * T * C + B * T * H + C * 3 * H) * itemsize,
    )

    return pl.pallas_call(
        _head_kernel,
        out_shape=jax.ShapeDtypeStruct((B, T, H), x.dtype),
        grid_spec=pltpu.PrefetchScalarGridSpec(
            num_scalar_prefetch=0,
            grid=(B // bblk,),
            in_specs=[
                pl.BlockSpec((bblk, T, C), lambda b: (b, 0, 0)),
                pl.BlockSpec((C, 3 * H), lambda b: (0, 0)),
            ],
            out_specs=pl.BlockSpec((bblk, T, H), lambda b: (b, 0, 0)),
        ),
        compiler_params=pltpu.CompilerParams(
            dimension_semantics=("parallel",),
            vmem_limit_bytes=_vmem_limit_bytes(bblk, T, C, H, itemsize),
        ),
        cost_estimate=cost,
    )(x, w_kqv)


def head_reference(x, wk, wq, wv):
    """Pure-JAX reference with identical semantics (for a sanity check)."""
    B, T, C = x.shape
    k = x @ wk
    q = x @ wq
    v = x @ wv
    wei = (q @ jnp.swapaxes(k, -2, -1)) * (C ** -0.5)
    mask = jnp.tril(jnp.ones((T, T), dtype=bool))
    wei = jnp.where(mask, wei, -jnp.inf)
    wei = jax.nn.softmax(wei, axis=-1)
    return wei @ v


if __name__ == "__main__":
    # Small shapes consistent with the module's forward:
    # batch=2, seq T=8 (< block_size=256), embedding C=384 (n_embed), head_size=64.
    B, T, C, H = 2, 8, 384, 64

    key = jax.random.PRNGKey(0)
    kx, kk, kq, kv = jax.random.split(key, 4)

    x = jax.random.normal(kx, (B, T, C), dtype=jnp.float32)
    # Deterministic "Linear(n_embed, head_size, bias=False)" weights, stored as [C, H].
    wk = jax.random.normal(kk, (C, H), dtype=jnp.float32) * (C ** -0.5)
    wq = jax.random.normal(kq, (C, H), dtype=jnp.float32) * (C ** -0.5)
    wv = jax.random.normal(kv, (C, H), dtype=jnp.float32) * (C ** -0.5)

    out = head_forward(x, wk, wq, wv)
    jax.block_until_ready(out)

    ref = head_reference(x, wk, wq, wv)
    assert out.shape == (B, T, H)
    # Slightly looser tolerance: the softmax denominator uses the EUP's
    # approximate reciprocal (each attention row scaled by ~1 +/- 2^-12).
    assert jnp.allclose(out, ref, atol=5e-3, rtol=5e-3)

    print("KERNEL_OK")
</pallas_src>

<mosaic_0001>
module attributes {stable_mosaic.version = 11 : i64} {
  func.func @_head_kernel(%arg0: i32, %arg1: memref<1x8x384xf32, #tpu.memory_space<vmem>>, %arg2: memref<384x192xf32, #tpu.memory_space<vmem>>, %arg3: memref<1x8x64xf32, #tpu.memory_space<vmem>>) attributes {dimension_semantics = [#tpu.dimension_semantics<parallel>], iteration_bounds = array<i64: 2>, scalar_prefetch = 0 : i64, scratch_operands = 0 : i64, tpu.core_type = #tpu.core_type<tc>, window_params = [{transform_indices = @transform_0, window_bounds = array<i64: 1, 8, 384>}, {pipeline_mode = #tpu.pipeline_mode<synchronous>, transform_indices = @transform_1, window_bounds = array<i64: 384, 192>}, {transform_indices = @transform_2, window_bounds = array<i64: 1, 8, 64>}]} {
    %c0 = arith.constant 0 : index
    %c0_0 = arith.constant 0 : index
    %c0_1 = arith.constant 0 : index
    %0 = vector.load %arg1[%c0, %c0_0, %c0_1] : memref<1x8x384xf32, #tpu.memory_space<vmem>>, vector<1x8x384xf32>
    %1 = vector.shape_cast %0 : vector<1x8x384xf32> to vector<8x384xf32>
    %c0_2 = arith.constant 0 : index
    %c0_3 = arith.constant 0 : index
    %2 = vector.load %arg2[%c0_2, %c0_3] : memref<384x192xf32, #tpu.memory_space<vmem>>, vector<384x192xf32>
    %cst = arith.constant dense<0.000000e+00> : vector<8x192xf32>
    %3 = tpu.matmul %1, %2, %cst {dimension_numbers = #tpu.dot_dimension_numbers<[1], [0], [0], [1], [0, 0, 1, 1], [], []>} : vector<8x384xf32>, vector<384x192xf32>, vector<8x192xf32> -> vector<8x192xf32>
    %cst_4 = arith.constant 3.840000e+02 : f32
    %cst_5 = arith.constant -5.000000e-01 : f32
    %4 = math.powf %cst_4, %cst_5 : f32
    %5 = vector.extract_strided_slice %3 {offsets = [0, 0], sizes = [8, 64], strides = [1, 1]} : vector<8x192xf32> to vector<8x64xf32>
    %6 = vector.extract_strided_slice %3 {offsets = [0, 64], sizes = [8, 64], strides = [1, 1]} : vector<8x192xf32> to vector<8x64xf32>
    %7 = vector.broadcast %4 : f32 to vector<8x64xf32>
    %8 = arith.mulf %6, %7 : vector<8x64xf32>
    %9 = vector.extract_strided_slice %3 {offsets = [0, 128], sizes = [8, 64], strides = [1, 1]} : vector<8x192xf32> to vector<8x64xf32>
    %10 = vector.shape_cast %5 : vector<8x64xf32> to vector<1x8x64xf32>
    %11 = vector.shape_cast %8 : vector<8x64xf32> to vector<1x8x64xf32>
    %12 = vector.shape_cast %9 : vector<8x64xf32> to vector<1x8x64xf32>
    %cst_6 = arith.constant dense<0.000000e+00> : vector<1x8x8xf32>
    %13 = tpu.matmul %11, %10, %cst_6 {dimension_numbers = #tpu.dot_dimension_numbers<[2], [2], [1], [1], [0, 0, 0, 1, 1, 1], [0], [0]>} : vector<1x8x64xf32>, vector<1x8x64xf32>, vector<1x8x8xf32> -> vector<1x8x8xf32>
    %14 = tpu.iota {dimensions = array<i32: 0>} : vector<8x1xi32>
    %15 = tpu.iota {dimensions = array<i32: 1>} : vector<1x8xi32>
    %16 = vector.broadcast %15 : vector<1x8xi32> to vector<8x8xi32>
    %17 = vector.broadcast %14 : vector<8x1xi32> to vector<8x8xi32>
    %18 = arith.cmpi sle, %16, %17 : vector<8x8xi32>
    %19 = vector.shape_cast %18 : vector<8x8xi1> to vector<1x8x8xi1>
    %cst_7 = arith.constant 0xFF800000 : f32
    %20 = vector.broadcast %cst_7 : f32 to vector<1x8x8xf32>
    %21 = arith.select %19, %13, %20 : vector<1x8x8xi1>, vector<1x8x8xf32>
    %cst_8 = arith.constant dense<0xFF800000> : vector<1x8xf32>
    %22 = vector.multi_reduction <maximumf>, %21, %cst_8 [2] : vector<1x8x8xf32> to vector<1x8xf32>
    %23 = vector.shape_cast %22 : vector<1x8xf32> to vector<1x8x1xf32>
    %24 = vector.broadcast %23 : vector<1x8x1xf32> to vector<1x8x8xf32>
    %25 = arith.subf %21, %24 : vector<1x8x8xf32>
    %26 = math.exp %25 : vector<1x8x8xf32>
    %cst_9 = arith.constant dense<0.000000e+00> : vector<1x8xf32>
    %27 = vector.multi_reduction <add>, %26, %cst_9 [2] : vector<1x8x8xf32> to vector<1x8xf32>
    %28 = vector.shape_cast %27 : vector<1x8xf32> to vector<1x8x1xf32>
    %29 = tpu.reciprocal %28 {approx = true} : vector<1x8x1xf32> -> vector<1x8x1xf32>
    %30 = vector.broadcast %29 : vector<1x8x1xf32> to vector<1x8x8xf32>
    %31 = arith.mulf %26, %30 : vector<1x8x8xf32>
    %cst_10 = arith.constant dense<0.000000e+00> : vector<1x8x64xf32>
    %32 = tpu.matmul %31, %12, %cst_10 {dimension_numbers = #tpu.dot_dimension_numbers<[2], [1], [1], [2], [0, 0, 0, 1, 1, 2], [0], [0]>} : vector<1x8x8xf32>, vector<1x8x64xf32>, vector<1x8x64xf32> -> vector<1x8x64xf32>
    %c0_11 = arith.constant 0 : index
    %c0_12 = arith.constant 0 : index
    %c0_13 = arith.constant 0 : index
    %33 = vector.load %arg3[%c0_11, %c0_12, %c0_13] : memref<1x8x64xf32, #tpu.memory_space<vmem>>, vector<1x8x64xf32>
    tpu.vector_store %arg3[%c0_11, %c0_12, %c0_13], %32 {strides = array<i32>} : memref<1x8x64xf32, #tpu.memory_space<vmem>>, vector<1x8x64xf32>,
    return
  }
  func.func @transform_0(%arg0: i32) -> (i32, i32, i32) {
    %c0_i32 = arith.constant 0 : i32
    %c0_i32_0 = arith.constant 0 : i32
    %c0_i32_1 = arith.constant 0 : i32
    return %arg0, %c0_i32, %c0_i32_0 : i32, i32, i32
  }
  func.func @transform_1(%arg0: i32) -> (i32, i32) {
    %c0_i32 = arith.constant 0 : i32
    %c0_i32_0 = arith.constant 0 : i32
    %c0_i32_1 = arith.constant 0 : i32
    return %c0_i32, %c0_i32_0 : i32, i32
  }
  func.func @transform_2(%arg0: i32) -> (i32, i32, i32) {
    %c0_i32 = arith.constant 0 : i32
    %c0_i32_0 = arith.constant 0 : i32
    %c0_i32_1 = arith.constant 0 : i32
    return %arg0, %c0_i32, %c0_i32_0 : i32, i32, i32
  }
}

</mosaic_0001>

<bundles_post_ra>
// kernel: tpu_custom_call.1
= control target key start
LH: loop header
LB: loop body
LE: loop exit
PB: predicated region body
PF: predicated region fallthrough
CT: control target
= control target key end

     0   :  { %7 = vsyncpa [#allocation3], 0  ;;  %s1193_s0 = inlined_call_operand.vmem [shape: f32[2,8,384], index: 0, kind: input, shape index: {}]   ;;  %s1194_s1 = inlined_call_operand.vmem [shape: f32[384,192], index: 1, kind: input, shape index: {}]   ;;  %s1195_s2 = inlined_call_operand.hbm [shape: f32[2,8,64], index: 2, kind: output, shape index: {}]  }
   0x1   :  { %9 = vsyncpa [#allocation3 + $0x1], 0  ;;  %s783_s9 = smov 0   ;;  %s785_s10 = smov 0  }
   0x2   :  { %s787_s11 = smov 0   ;;  %s789_s12 = smov 0  }
   0x3 LB: > { %s804_s13 = sadd.s32 4294967295, %s762_s12   ;;  %s628_s14 = sadd.s32 4294967294, %s762_s12   ;;  %s762_s12 = sphi %s789_s12, %s1201_s12   ;;  %s758_s11 = sphi %s787_s11, %s1200_s11   ;;  %s754_s10 = sphi %s785_s10, %s1199_s10   ;;  %s750_s9 = sphi %s783_s9, %s1198_s9  }
   0x4   : > { %s808_s15 = sadd.s32 1, %s762_s12   ;;  %s69_s16 = sadd.s32 1, %s758_s11 }
   0x5   : > { %s66_s17 = ssub.s32 %s762_s12, %s808_s15  ;;  %p79_p0 = scmp.ne.s32.totalorder %s758_s11, %s754_s10 }
   0x6   : > { %p67_p1 = scmp.eq.s32.totalorder %s66_s17, 0  ;;  %p80_p2 = scmp.eq.s32.totalorder %s804_s13, 1 }
   0x7   : > { %p85_p3 = scmp.ne.s32.totalorder %s754_s10, %s750_s9  ;;  %p86_p4 = scmp.eq.s32.totalorder %s628_s14, 1 }
   0x8   : > { %s819_s18 = scalar_select %p67_p1, %s758_s11, %s69_s16  }
   0x9   : > { %p821_p5 = por %p80_p2, %p79_p0  ;;  %p825_p6 = por %p86_p4, %p85_p3 }
   0xa   : > { %p631_p7 = scmp.ge.s32.totalorder %s762_s12, 1  ;;  %p115_p8 = scmp.lt.s32.totalorder %s762_s12, 3 }
   0xc   : > { %p116_p9 = pnand %p631_p7, %p115_p8 }
   0xd   : > { %p137_p10 = scmp.lt.s32.totalorder (!%p116_p9), %s804_s13, 1  ;;  %s766_s30 = smov (!%p116_p9), 64  }
   0xe   : > { %119 = sbr.rel (%p116_p9) target bundleno = 1109 (0x455), region = 28  ;;  %s638_s7 = sshll.u32 (!%p116_p9), %s804_s13, 7 }
   0xf   : > { %s1151_s21 = scalar_lea.hbm (!%p116_p9), %s1195_s2, %s638_s7 }
  0x13   : > { %v176_v0 = vld [vmem:[%s1194_s1 + $0xf8] sm:$0xff]  ;;  %v175_v1 = vld [vmem:[%s1194_s1 + $0xf0] sm:$0xff]  ;;  %v174_v2 = vld [vmem:[%s1194_s1 + $0xe8] sm:$0xff]  ;;  %v764_v4 = vmov 0.0   ;;  %s998_s6 = scalar_select %p137_p10, %s804_s13, 1  ;;  %vm765_vm0 = vmmov 0  }
  0x14   : > { %241 = vmatprep.subr.mxu0 %v176_v0  ;;  %v173_v3 = vld [vmem:[%s1194_s1 + $0xe0] sm:$0xff]  ;;  %376 = vmatprep.mubr.f32.mxu1 %v764_v4  ;;  %v172_v5 = vld [vmem:[%s1194_s1 + $0xd8] sm:$0xff]  ;;  %v171_v6 = vld [vmem:[%s1194_s1 + $0xd0] sm:$0xff]  ;;  %vm387_vm1 = vcmask 523264   ;;  %vm469_vm3 = vcmask 64512   ;;  %s767_s13 = smov [#allocation2]  }
  0x15   : > { %242 = vmatpush1.msra.mxu0 %v175_v1  ;;  %v170_v7 = vld [vmem:[%s1194_s1 + $0xc8] sm:$0xff]  ;;  %v169_v8 = vld [vmem:[%s1194_s1 + $0xc0] sm:$0xff]  ;;  %v168_v9 = vld [vmem:[%s1194_s1 + $0xb8] sm:$0xff]  ;;  %s655_s4 = smul.u32 24, %s998_s6  ;;  %s706_s6 = sshll.u32 %s767_s13, 4  ;;  %s707_s6 = int_to_ptr.vmem [resolvable:$false] %s706_s6 }
  0x16   : > { %243 = vmatprep.subr.mxu0 %v174_v2  ;;  %v167_v10 = vld [vmem:[%s1194_s1 + $0xb0] sm:$0xff]  ;;  %v166_v11 = vld [vmem:[%s1194_s1 + $0xa8] sm:$0xff]  ;;  %v165_v12 = vld [vmem:[%s1194_s1 + $0xa0] sm:$0xff]  ;;  %s708_s23 = scalar_lea.vmem %s707_s6, 256 }
  0x17   : > { %244 = vmatpush1.msra.mxu0 %v173_v3  ;;  %v164_v13 = vld [vmem:[%s1194_s1 + $0x98] sm:$0xff]  ;;  %v163_v15 = vld [vmem:[%s1194_s1 + $0x90] sm:$0xff]  ;;  %v238_v17 = vld [vmem:[%s1194_s1 + $0x2e8] sm:$0xff]  ;;  %s1052_s5 = scalar_lea.vmem %s1193_s0, %s655_s4 }
  0x18   : > { %245 = vmatprep.subr.mxu0 %v172_v5  ;;  %v240_v14 = vld [vmem:[%s1194_s1 + $0x2f8] sm:$0xff]  ;;  %v239_v16 = vld [vmem:[%s1194_s1 + $0x2f0] sm:$0xff]  ;;  %v162_v18 = vld [vmem:[%s1194_s1 + $0x88] sm:$0xff] }
  0x19   : > { %246 = vmatpush1.msra.mxu0 %v171_v6  ;;  %312 = vmatprep.subr.mxu1 %v240_v14  ;;  %v237_v19 = vld [vmem:[%s1194_s1 + $0x2e0] sm:$0xff]  ;;  %v236_v21 = vld [vmem:[%s1194_s1 + $0x2d8] sm:$0xff]  ;;  %v235_v22 = vld [vmem:[%s1194_s1 + $0x2d0] sm:$0xff] }
  0x1a   : > { %247 = vmatprep.subr.mxu0 %v170_v7  ;;  %313 = vmatpush1.msra.mxu1 %v239_v16  ;;  %v161_v20 = vld [vmem:[%s1194_s1 + $0x80] sm:$0xff]  ;;  %v160_v23 = vld [vmem:[%s1194_s1 + $0x78] sm:$0xff]  ;;  %v234_v24 = vld [vmem:[%s1194_s1 + $0x2c8] sm:$0xff] }
  0x1b   : > { %248 = vmatpush1.msra.mxu0 %v169_v8  ;;  %314 = vmatprep.subr.mxu1 %v238_v17  ;;  %v159_v25 = vld [vmem:[%s1194_s1 + $0x70] sm:$0xff]  ;;  %v233_v26 = vld [vmem:[%s1194_s1 + $0x2c0] sm:$0xff]  ;;  %v158_v27 = vld [vmem:[%s1194_s1 + $0x68] sm:$0xff] }
  0x1c   : > { %249 = vmatprep.subr.mxu0 %v168_v9  ;;  %315 = vmatpush1.msra.mxu1 %v237_v19  ;;  %v232_v28 = vld [vmem:[%s1194_s1 + $0x2b8] sm:$0xff]  ;;  %v157_v29 = vld [vmem:[%s1194_s1 + $0x60] sm:$0xff]  ;;  %v231_v30 = vld [vmem:[%s1194_s1 + $0x2b0] sm:$0xff] }
  0x1d   : > { %250 = vmatpush1.msra.mxu0 %v167_v10  ;;  %316 = vmatprep.subr.mxu1 %v236_v21  ;;  %v156_v31 = vld [vmem:[%s1194_s1 + $0x58] sm:$0xff]  ;;  %v230_v32 = vld [vmem:[%s1194_s1 + $0x2a8] sm:$0xff]  ;;  %v155_v33 = vld [vmem:[%s1194_s1 + $0x50] sm:$0xff] }
  0x1e   : > { %251 = vmatprep.subr.mxu0 %v166_v11  ;;  %317 = vmatpush1.msra.mxu1 %v235_v22  ;;  %v229_v34 = vld [vmem:[%s1194_s1 + $0x2a0] sm:$0xff]  ;;  %v154_v35 = vld [vmem:[%s1194_s1 + $0x48] sm:$0xff]  ;;  %v228_v36 = vld [vmem:[%s1194_s1 + $0x298] sm:$0xff] }
  0x1f   : > { %252 = vmatpush1.msra.mxu0 %v165_v12  ;;  %318 = vmatprep.subr.mxu1 %v234_v24  ;;  %v153_v37 = vld [vmem:[%s1194_s1 + $0x40] sm:$0xff]  ;;  %v227_v38 = vld [vmem:[%s1194_s1 + $0x290] sm:$0xff]  ;;  %v152_v39 = vld [vmem:[%s1194_s1 + $0x38] sm:$0xff] }
  0x20   : > { %253 = vmatprep.subr.mxu0 %v164_v13  ;;  %319 = vmatpush1.msra.mxu1 %v233_v26  ;;  %v226_v40 = vld [vmem:[%s1194_s1 + $0x288] sm:$0xff]  ;;  %v151_v41 = vld [vmem:[%s1194_s1 + $0x30] sm:$0xff]  ;;  %v225_v42 = vld [vmem:[%s1194_s1 + $0x280] sm:$0xff] }
  0x21   : > { %254 = vmatpush1.msra.mxu0 %v163_v15  ;;  %320 = vmatprep.subr.mxu1 %v232_v28  ;;  %v150_v43 = vld [vmem:[%s1194_s1 + $0x28] sm:$0xff]  ;;  %v224_v44 = vld [vmem:[%s1194_s1 + $0x278] sm:$0xff]  ;;  %v149_v45 = vld [vmem:[%s1194_s1 + $0x20] sm:$0xff] }
  0x22   : > { %255 = vmatprep.subr.mxu0 %v162_v18  ;;  %321 = vmatpush1.msra.mxu1 %v231_v30  ;;  %v223_v46 = vld [vmem:[%s1194_s1 + $0x270] sm:$0xff]  ;;  %v148_v47 = vld [vmem:[%s1194_s1 + $0x18] sm:$0xff]  ;;  %v222_v48 = vld [vmem:[%s1194_s1 + $0x268] sm:$0xff] }
  0x23   : > { %256 = vmatpush1.msra.mxu0 %v161_v20  ;;  %322 = vmatprep.subr.mxu1 %v230_v32  ;;  %v147_v49 = vld [vmem:[%s1194_s1 + $0x10] sm:$0xff]  ;;  %v221_v50 = vld [vmem:[%s1194_s1 + $0x260] sm:$0xff]  ;;  %v146_v51 = vld [vmem:[%s1194_s1 + $0x8] sm:$0xff] }
  0x24   : > { %257 = vmatprep.subr.mxu0 %v160_v23  ;;  %323 = vmatpush1.msra.mxu1 %v229_v34  ;;  %v220_v52 = vld [vmem:[%s1194_s1 + $0x258] sm:$0xff]  ;;  %v145_v53 = vld [vmem:[%s1194_s1] sm:$0xff]  ;;  %v219_v54 = vld [vmem:[%s1194_s1 + $0x250] sm:$0xff] }
  0x25   : > { %258 = vmatpush1.msra.mxu0 %v159_v25  ;;  %324 = vmatprep.subr.mxu1 %v228_v36  ;;  %v208_v55 = vld [vmem:[%s1194_s1 + $0x1f8] sm:$0xff]  ;;  %v218_v56 = vld [vmem:[%s1194_s1 + $0x248] sm:$0xff]  ;;  %v207_v57 = vld [vmem:[%s1194_s1 + $0x1f0] sm:$0xff] }
  0x26   : > { %259 = vmatprep.subr.mxu0 %v158_v27  ;;  %325 = vmatpush1.msra.mxu1 %v227_v38  ;;  %v217_v58 = vld [vmem:[%s1194_s1 + $0x240] sm:$0xff]  ;;  %v206_v59 = vld [vmem:[%s1194_s1 + $0x1e8] sm:$0xff]  ;;  %v216_v60 = vld [vmem:[%s1194_s1 + $0x238] sm:$0xff] }
  0x27   : > { %260 = vmatpush1.msra.mxu0 %v157_v29  ;;  %326 = vmatprep.subr.mxu1 %v226_v40  ;;  %v205_v61 = vld [vmem:[%s1194_s1 + $0x1e0] sm:$0xff]  ;;  %v215_v62 = vld [vmem:[%s1194_s1 + $0x230] sm:$0xff]  ;;  %v204_v63 = vld [vmem:[%s1194_s1 + $0x1d8] sm:$0xff] }
  0x28   : > { %261 = vmatprep.subr.mxu0 %v156_v31  ;;  %327 = vmatpush1.msra.mxu1 %v225_v42  ;;  %v214_v0 = vld [vmem:[%s1194_s1 + $0x228] sm:$0xff]  ;;  %v203_v1 = vld [vmem:[%s1194_s1 + $0x1d0] sm:$0xff]  ;;  %v213_v2 = vld [vmem:[%s1194_s1 + $0x220] sm:$0xff] }
  0x29   : > { %262 = vmatpush1.msra.mxu0 %v155_v33  ;;  %328 = vmatprep.subr.mxu1 %v224_v44  ;;  %v202_v3 = vld [vmem:[%s1194_s1 + $0x1c8] sm:$0xff]  ;;  %v212_v5 = vld [vmem:[%s1194_s1 + $0x218] sm:$0xff]  ;;  %v201_v6 = vld [vmem:[%s1194_s1 + $0x1c0] sm:$0xff] }
  0x2a   : > { %263 = vmatprep.subr.mxu0 %v154_v35  ;;  %329 = vmatpush1.msra.mxu1 %v223_v46  ;;  %v211_v7 = vld [vmem:[%s1194_s1 + $0x210] sm:$0xff]  ;;  %v200_v8 = vld [vmem:[%s1194_s1 + $0x1b8] sm:$0xff]  ;;  %v210_v9 = vld [vmem:[%s1194_s1 + $0x208] sm:$0xff] }
  0x2b   : > { %264 = vmatpush1.msra.mxu0 %v153_v37  ;;  %330 = vmatprep.subr.mxu1 %v222_v48  ;;  %v199_v10 = vld [vmem:[%s1194_s1 + $0x1b0] sm:$0xff]  ;;  %v209_v11 = vld [vmem:[%s1194_s1 + $0x200] sm:$0xff]  ;;  %v198_v12 = vld [vmem:[%s1194_s1 + $0x1a8] sm:$0xff] }
  0x2c   : > { %265 = vmatprep.subr.mxu0 %v152_v39  ;;  %331 = vmatpush1.msra.mxu1 %v221_v50  ;;  %v144_v13 = vld [vmem:[%s1052_s5 + $0x10] sm:$0xff]  ;;  %v197_v14 = vld [vmem:[%s1194_s1 + $0x1a0] sm:$0xff]  ;;  %v143_v15 = vld [vmem:[%s1052_s5 + $0x8] sm:$0xff] }
  0x2d   : > { %266 = vmatpush1.msra.mxu0 %v151_v41  ;;  %332 = vmatprep.subr.mxu1 %v220_v52  ;;  %v196_v16 = vld [vmem:[%s1194_s1 + $0x198] sm:$0xff]  ;;  %v195_v17 = vld [vmem:[%s1194_s1 + $0x190] sm:$0xff]  ;;  %v194_v18 = vld [vmem:[%s1194_s1 + $0x188] sm:$0xff] }
  0x2e   : > { %267 = vmatprep.subr.mxu0 %v150_v43  ;;  %333 = vmatpush1.msra.mxu1 %v219_v54  ;;  %v193_v19 = vld [vmem:[%s1194_s1 + $0x180] sm:$0xff]  ;;  %v192_v20 = vld [vmem:[%s1194_s1 + $0x178] sm:$0xff]  ;;  %v191_v21 = vld [vmem:[%s1194_s1 + $0x170] sm:$0xff] }
  0x2f   : > { %268 = vmatpush1.msra.mxu0 %v149_v45  ;;  %334 = vmatprep.subr.mxu1 %v218_v56  ;;  %v190_v22 = vld [vmem:[%s1194_s1 + $0x168] sm:$0xff]  ;;  %v189_v23 = vld [vmem:[%s1194_s1 + $0x160] sm:$0xff]  ;;  %v188_v24 = vld [vmem:[%s1194_s1 + $0x158] sm:$0xff]  ;;  %v463_v45 = vlaneseq }
  0x30   : > { %269 = vmatprep.subr.mxu0 %v148_v47  ;;  %335 = vmatpush1.msra.mxu1 %v217_v58  ;;  %v187_v25 = vld [vmem:[%s1194_s1 + $0x150] sm:$0xff]  ;;  %v186_v26 = vld [vmem:[%s1194_s1 + $0x148] sm:$0xff]  ;;  %v185_v27 = vld [vmem:[%s1194_s1 + $0x140] sm:$0xff] }
  0x31   : > { %270 = vmatpush1.msra.mxu0 %v147_v49  ;;  %336 = vmatprep.subr.mxu1 %v216_v60  ;;  %v184_v28 = vld [vmem:[%s1194_s1 + $0x138] sm:$0xff]  ;;  %v183_v29 = vld [vmem:[%s1194_s1 + $0x130] sm:$0xff]  ;;  %v182_v30 = vld [vmem:[%s1194_s1 + $0x128] sm:$0xff]  ;;  %v464_v46 = vshrl.u32 %v463_v45, 7  ;;  %v466_v47 = vand.u32 127, %v463_v45 }
  0x32   : > { %271 = vmatprep.subr.mxu0 %v146_v51  ;;  %337 = vmatpush1.msra.mxu1 %v215_v62  ;;  %v181_v31 = vld [vmem:[%s1194_s1 + $0x120] sm:$0xff]  ;;  %v180_v32 = vld [vmem:[%s1194_s1 + $0x118] sm:$0xff]  ;;  %v179_v33 = vld [vmem:[%s1194_s1 + $0x110] sm:$0xff] }
  0x33   : > { %272 = vmatpush1.msra.mxu0 %v145_v53  ;;  %338 = vmatprep.subr.mxu1 %v214_v0  ;;  %v178_v34 = vld [vmem:[%s1194_s1 + $0x108] sm:$0xff]  ;;  %v177_v35 = vld [vmem:[%s1194_s1 + $0x100] sm:$0xff]  ;;  %vm467_vm2 = vcmp.le.s32.totalorder %v466_v47, %v464_v46 }
  0x34   : > { %273 = vmatprep.subr.mxu0 %v208_v55  ;;  %339 = vmatpush1.msra.mxu1 %v213_v2  ;;  %v142_v36 = vld [vmem:[%s1052_s5] sm:$0xff]  ;;  %s134_s5 = sand.u32 1, %s754_s10  }
  0x35   : > { %274 = vmatpush2.msra.mxu0 %v207_v57  ;;  %340 = vmatprep.subr.mxu1 %v212_v5  ;;  %s632_s3 = sshll.u32 %s134_s5, 3  ;;  %s556_s4 = scalar_lea.sflag [#allocation3], %s134_s5 }
  0x36   : > { %275 = vmatprep.subr.mxu0 %v206_v59  ;;  %341 = vmatpush1.msra.mxu1 %v211_v7  ;;  %s136_s8 = scalar_lea.vmem [#allocation2], %s632_s3 }
  0x37   : > { %276 = vmatpush2.msra.mxu0 %v205_v61  ;;  %342 = vmatprep.subr.mxu1 %v210_v9  ;;  %s569_s14 = sshll.u32 %s136_s8, 4  ;;  %s1153_s14 = int_to_ptr.vmem [resolvable:$true] %s569_s14 }
  0x38   : > { %277 = vmatprep.subr.mxu0 %v204_v63  ;;  %343 = vmatpush1.msra.mxu1 %v209_v11  ;;  %s702_s22 = scalar_lea.vmem %s1153_s14, 128  ;;  %p709_p0 = scmp.lt.s32.totalorder %s1153_s14, %s707_s6 }
  0x39   : > { %278 = vmatpush2.msra.mxu0 %v203_v1  ;;  %377 = vmatmul.mubr.f32.vlgmr.msra.gmra.mxu1 %v144_v13  ;;  %p703_p11 = scmp.ne.s32.totalorder %s1153_s14, %s702_s22  ;;  %p710_p1 = scmp.lt.s32.totalorder %s708_s23, %s702_s22 }
  0x3a   : > { %279 = vmatprep.subr.mxu0 %v202_v3  ;;  %305 = vmatprep.mubr.f32.mxu0 %v143_v15 }
  0x3b   : > { %280 = vmatpush2.msra.mxu0 %v201_v6  ;;  %645 = vmatprep.subr.mxu1 %v764_v4  ;;  %p704_p12 = pnand %p703_p11, %p821_p5  ;;  %p711_p2 = por %p710_p1, %p709_p0 }
  0x3c   : > { %281 = vmatprep.subr.mxu0 %v200_v8  ;;  %647 = vmatprep.mubr.msk.f32.mxu1 %vm765_vm0, %v764_v4 }
  0x3d   : > { %282 = vmatpush2.msra.mxu0 %v199_v10  ;;  %p705_p13 = pneg %p704_p12 }
  0x3e   : > { %283 = vmatprep.subr.mxu0 %v198_v12 }
  0x3f   : > { %284 = vmatpush2.msra.mxu0 %v197_v14  ;;  %p712_p3 = pnand %p711_p2, %p705_p13 }
  0x40   : > { %285 = vmatprep.subr.mxu0 %v196_v16 }
  0x41   : > { %286 = vmatpush2.msra.mxu0 %v195_v17 }
  0x42   : > { %287 = vmatprep.subr.mxu0 %v194_v18 }
  0x43   : > { %288 = vmatpush2.msra.mxu0 %v193_v19 }
  0x44   : > { %289 = vmatprep.subr.mxu0 %v192_v20 }
  0x45   : > { %290 = vmatpush2.msra.mxu0 %v191_v21 }
  0x46   : > { %291 = vmatprep.subr.mxu0 %v190_v22 }
  0x47   : > { %292 = vmatpush2.msra.mxu0 %v189_v23 }
  0x48   : > { %293 = vmatprep.subr.mxu0 %v188_v24 }
  0x49   : > { %294 = vmatpush2.msra.mxu0 %v187_v25 }
  0x4a   : > { %295 = vmatprep.subr.mxu0 %v186_v26 }
  0x4b   : > { %296 = vmatpush2.msra.mxu0 %v185_v27 }
  0x4c   : > { %297 = vmatprep.subr.mxu0 %v184_v28 }
  0x4d   : > { %298 = vmatpush2.msra.mxu0 %v183_v29 }
  0x4e   : > { %299 = vmatprep.subr.mxu0 %v182_v30 }
  0x4f   : > { %300 = vmatpush2.msra.mxu0 %v181_v31 }
  0x50   : > { %301 = vmatprep.subr.mxu0 %v180_v32 }
  0x51   : > { %302 = vmatpush2.msra.mxu0 %v179_v33 }
  0x52   : > { %303 = vmatprep.subr.mxu0 %v178_v34 }
  0x53   : > { %304 = vmatpush2.msra.mxu0 %v177_v35 }
  0x54   : > { %306 = vmatmul.mubr.f32.vlgmr.msra.gmra.mxu0 %v142_v36 }
  0xf9   : > { %v378_v37 = vpop.f32.mrf.mxu1 }
  0xfb   : > { %v380_v42 = vpop.f32.mrf.mxu1 }
 0x114   : > { %v307_v38 = vpop.f32.mrf.mxu0 }
 0x115   : > { %v379_v39 = vadd.f32 %v378_v37, %v307_v38 }
 0x116   : > { %v309_v41 = vpop.f32.mrf.mxu0 }
 0x117   : > { %646 = vmatpush3.xpose.msk.msra.mxu1 %vm387_vm1, %v379_v39  ;;  %v383_v40 = vmul.f32 0.05103104, %v379_v39  ;;  %v381_v43 = vadd.f32 %v380_v42, %v309_v41 }
 0x118   : > { %650 = vmatprep.subr.mxu1 %v764_v4 }
 0x119   : > { %385 = vrot.lane.b32.xlu0 %v383_v40, %s766_s30 }
 0x18b   : > { %v386_v44 = vpop.permute.xlu0 %385 }
 0x18c   : > { %648 = vmatmul.mubr.msk.f32.vlgmr.msra.gmra.mxu1 %vm387_vm1, %v386_v44 }
 0x18d   : > { %651 = vmatpush3.msra.mxu1 %v381_v43  ;;  %652 = vmatprep.mubr.msk.f32.mxu1 %vm765_vm0, %v764_v4 }
 0x24c   : > { %v459_v48 = vpop.f32.mrf.mxu1 }
 0x24d   : > { %v468_v49 = vsel %vm467_vm2, %v459_v48, -inf }
 0x24e   : > { %v649_v50 = vpop.f32.mrf.mxu1  ;;  %v470_v51 = vsel %vm469_vm3, %v468_v49, -inf }
 0x24f   : > { %471 = vmax.xlane.f32.xlu0 %v470_v51 }
 0x2d8   : > { %v472_v52 = vpop.xlane.xlu0 %471 }
 0x2d9   : > { %v473_v53 = vsub.f32 %v468_v49, %v472_v52 }
 0x2db   : > { %v474_v54 = vmul.f32 1.442695, %v473_v53 }
 0x2dd   : > { %698 = vpow2.f32 %v474_v54 }
 0x2ea   : > { %v699_v55 = vpop.eup %698 }
 0x2eb   : > { %v476_v4 = vsel %vm469_vm3, %v699_v55, 0.0 }
 0x2ec   : > { %477 = vadd.xlane.f32.xlu1 %v476_v4 }
 0x375   : > { %v478_v56 = vpop.xlane.xlu1 %477 }
 0x376   : > { %700 = vrcp.f32 %v478_v56 }
 0x383   : > { %v701_v57 = vpop.eup %700 }
 0x384   : > { %v480_v58 = vmul.f32 %v701_v57, %v699_v55 }
 0x386   : > { %653 = vmatmul.mubr.msk.f32.vlgmr.msra.gmra.mxu1 %vm469_vm3, %v480_v58 }
 0x446   : > { %v550_v59 = vpop.f32.mrf.mxu1 }
 0x447   : > { %554 = vst.msk [vmem:[%s136_s8] sm:$0xff] %vm387_vm1, %v550_v59 }
 0x448   : > { %v654_v60 = vpop.f32.mrf.mxu1 }
 0x449   : > { %715 = shalt.err (!%p712_p3)
}
 0x44a   : > { %s716_s24 = scalar_lea.hbm %s1151_s21, 128  ;;  %s720_s27 = scalar_lea.hbm %s1195_s2, 256 }
 0x44b   : > { %p717_p4 = scmp.ne.s32.totalorder %s1151_s21, %s716_s24  ;;  %p721_p9 = scmp.lt.s32.totalorder %s1151_s21, %s1195_s2 }
 0x44c   : > { %p722_p10 = scmp.lt.s32.totalorder %s720_s27, %s716_s24 }
 0x44d   : > { %p718_p7 = pnand %p717_p4, %p821_p5 }
 0x44e   : > { %p723_p11 = por %p722_p10, %p721_p9 }
 0x44f   : > { %p719_p8 = pneg %p718_p7 }
 0x451   : > { %p724_p12 = pnand %p723_p11, %p719_p8 }
 0x453   : > { %727 = shalt.err (!%p724_p12)
}
 0x454   : > { %656 = dma.vmem_to_hbm [thread:$0]  (%p821_p5), %s1153_s14, 128, %s1151_s21, %s556_s4  }
 0x455 PF: > { %p662_p13 = scmp.ge.s32.totalorder %s762_s12, 2  ;;  %s581_s30 = sand.u32 1, %s750_s9  }
 0x456   : > { %s582_s5 = scalar_lea.sflag [#allocation3], %s581_s30 }
 0x457   : > { %p659_p0 = pnand %p662_p13, %p825_p6 }
 0x459   : > { %p660_p1 = pneg %p659_p0 }
 0x45b   : > { %745 = dma.done.wait (%p660_p1), %s582_s5, 128  }
 0x45c   : > { %747 = vsyncadd (%p660_p1), %s582_s5, 4294967168  ;;  %p12_p2 = scmp.ge.s32.totalorder %s808_s15, 4   ;;  %s1198_s9 = smov %s754_s10 }
 0x45d   : > { %s1199_s10 = smov %s758_s11  ;;  %s1200_s11 = smov %s819_s18 }
 0x45e   : > { %s1201_s12 = smov %s808_s15  ;;  %14 = sbr.rel (!%p12_p2) target bundleno = 3 (0x3), region = 63 }
 0x463   :  { %587 = vsyncpa [#allocation3], 1 }
 0x464   :  { %589 = vsyncpa [#allocation3 + $0x1], 1 }

</bundles_post_ra>
